<compile_context>
chip_gen: v6e
topology: v6e:2x2x1
jax: 0.10.0
libtpu: 0.0.40
codegen_flags: <defaults>
</compile_context>

<pallas_src>
import functools
import math

import jax
import jax.numpy as jnp
from jax.experimental import pallas as pl
from jax.experimental.pallas import tpu as pltpu

IN_CHANNELS = 3
OUT_CHANNELS = 16
KERNEL_SIZE = 2
STRIDE = 2
PADDING = 1


def _round_up(x, m):
    return ((x + m - 1) // m) * m


def _conv_kernel_body(x_ref, w_ref, b_ref, o_ref):
    # x_ref: (M, K)        im2col patch matrix, M = n*ho*wo, K = kh*kw*cin
    # w_ref: (K, COUT_PAD) conv weights, Cout padded to 128 (lane-dense)
    # b_ref: (1, COUT_PAD) bias
    # o_ref: (M, COUT_PAD) output slab, one lane-dense store
    acc = jnp.dot(x_ref[...], w_ref[...], preferred_element_type=jnp.float32)
    o_ref[...] = (acc + b_ref[...]).astype(o_ref.dtype)


@functools.partial(jax.jit, static_argnames=("stride", "padding"))
def conv2d_forward(x, weight, bias, *, stride=STRIDE, padding=PADDING):
    """x: (N, Cin, H, W), weight: (Cout, Cin, kh, kw), bias: (Cout,) -> NCHW out."""
    n, cin, h, w = x.shape
    cout, wcin, kh, kw = weight.shape
    assert wcin == cin

    hp, wp = h + 2 * padding, w + 2 * padding
    ho = (hp - kh) // stride + 1
    wo = (wp - kw) // stride + 1

    # The space-to-depth im2col is exact when the taps are non-overlapping
    # (stride == kernel_size) and the padded extents tile evenly — true here.
    assert kh == stride and kw == stride, "fused kernel assumes stride == kernel_size"
    assert hp == ho * kh and wp == wo * kw, "padded extent must tile by the stride"
    assert cout <= 128, "kernel assumes a single 128-lane output tile"

    cout_pad = _round_up(cout, 128)   # lane-dense output; only the tiny weight/bias pad
    m = n * ho * wo                   # batch folded into M (162 here)
    k = kh * kw * cin                 # contraction dim (12 here)

    # Wrapper-side layout only: spatial pad, NHWC transpose, free space-to-depth
    # reshape, patch-major flatten. No K/M padding, no HBM im2col blow-up.
    xp = jnp.pad(x.astype(jnp.float32),
                 ((0, 0), (0, 0), (padding, padding), (padding, padding)))
    x2d = (xp.transpose(0, 2, 3, 1)            # NHWC: (n, hp, wp, cin)
             .reshape(n, ho, kh, wo, kw, cin)
             .transpose(0, 1, 3, 2, 4, 5)      # (n, ho, wo, kh, kw, cin)
             .reshape(m, k))

    # weight (Cout, Cin, kh, kw) -> (kh, kw, cin, cout) -> (K, Cout_pad),
    # matching the patch K ordering (kh major, then kw, then channel).
    w2d = jnp.pad(
        weight.astype(jnp.float32).transpose(2, 3, 1, 0).reshape(k, cout),
        ((0, 0), (0, cout_pad - cout)))
    b2d = jnp.pad(bias.astype(jnp.float32).reshape(1, cout),
                  ((0, 0), (0, cout_pad - cout)))

    # Single invocation: no grid, whole (tiny) operands resident in VMEM,
    # one MXU matmul, one lane-dense store.
    out = pl.pallas_call(
        _conv_kernel_body,
        out_shape=jax.ShapeDtypeStruct((m, cout_pad), jnp.float32),
        in_specs=[
            pl.BlockSpec(memory_space=pltpu.MemorySpace.VMEM),
            pl.BlockSpec(memory_space=pltpu.MemorySpace.VMEM),
            pl.BlockSpec(memory_space=pltpu.MemorySpace.VMEM),
        ],
        out_specs=pl.BlockSpec(memory_space=pltpu.MemorySpace.VMEM),
    )(x2d, w2d, b2d)

    # Drop the Cout padding and return NCHW like nn.Conv2d.
    return out[:, :cout].reshape(n, ho, wo, cout).transpose(0, 3, 1, 2)


def init_conv_params(key, in_channels, out_channels, kernel_size):
    """Deterministic init matching PyTorch Conv2d's default U(-1/sqrt(fan_in), +)."""
    fan_in = in_channels * kernel_size * kernel_size
    bound = 1.0 / math.sqrt(fan_in)
    kw_key, kb_key = jax.random.split(key)
    weight = jax.random.uniform(
        kw_key, (out_channels, in_channels, kernel_size, kernel_size),
        dtype=jnp.float32, minval=-bound, maxval=bound)
    bias = jax.random.uniform(
        kb_key, (out_channels,), dtype=jnp.float32, minval=-bound, maxval=bound)
    return weight, bias


if __name__ == "__main__":
    key = jax.random.PRNGKey(0)
    k_x, k_p = jax.random.split(key)

    # Small NCHW input consistent with the module: batch=2, C=3, H=W=16.
    x = jax.random.normal(k_x, (2, IN_CHANNELS, 16, 16), dtype=jnp.float32)
    weight, bias = init_conv_params(k_p, IN_CHANNELS, OUT_CHANNELS, KERNEL_SIZE)

    out = conv2d_forward(x, weight, bias, stride=STRIDE, padding=PADDING)
    out = jax.block_until_ready(out)

    # Reference check against XLA's conv (same semantics as nn.Conv2d forward).
    ref = jax.lax.conv_general_dilated(
        x, weight, window_strides=(STRIDE, STRIDE),
        padding=((PADDING, PADDING), (PADDING, PADDING)),
        dimension_numbers=("NCHW", "OIHW", "NCHW"),
    ) + bias.reshape(1, OUT_CHANNELS, 1, 1)

    assert out.shape == (2, OUT_CHANNELS, 9, 9), out.shape
    assert jnp.allclose(out, ref, atol=1e-5, rtol=1e-5)

    print("KERNEL_OK")
</pallas_src>

<mosaic_0001>
module attributes {stable_mosaic.version = 11 : i64} {
  func.func @_conv_kernel_body(%arg0: memref<162x12xf32, #tpu.memory_space<vmem>>, %arg1: memref<12x128xf32, #tpu.memory_space<vmem>>, %arg2: memref<1x128xf32, #tpu.memory_space<vmem>>, %arg3: memref<162x128xf32, #tpu.memory_space<vmem>>) attributes {dimension_semantics = [], scalar_prefetch = 0 : i64, scratch_operands = 0 : i64, tpu.core_type = #tpu.core_type<tc>} {
    %c0 = arith.constant 0 : index
    %c0_0 = arith.constant 0 : index
    %0 = vector.load %arg0[%c0, %c0_0] : memref<162x12xf32, #tpu.memory_space<vmem>>, vector<162x12xf32>
    %c0_1 = arith.constant 0 : index
    %c0_2 = arith.constant 0 : index
    %1 = vector.load %arg1[%c0_1, %c0_2] : memref<12x128xf32, #tpu.memory_space<vmem>>, vector<12x128xf32>
    %cst = arith.constant dense<0.000000e+00> : vector<162x128xf32>
    %2 = tpu.matmul %0, %1, %cst {dimension_numbers = #tpu.dot_dimension_numbers<[1], [0], [0], [1], [0, 0, 1, 1], [], []>} : vector<162x12xf32>, vector<12x128xf32>, vector<162x128xf32> -> vector<162x128xf32>
    %c0_3 = arith.constant 0 : index
    %c0_4 = arith.constant 0 : index
    %3 = vector.load %arg2[%c0_3, %c0_4] : memref<1x128xf32, #tpu.memory_space<vmem>>, vector<1x128xf32>
    %4 = vector.broadcast %3 : vector<1x128xf32> to vector<162x128xf32>
    %5 = arith.addf %2, %4 : vector<162x128xf32>
    %c0_5 = arith.constant 0 : index
    %c0_6 = arith.constant 0 : index
    %6 = vector.load %arg3[%c0_5, %c0_6] : memref<162x128xf32, #tpu.memory_space<vmem>>, vector<162x128xf32>
    tpu.vector_store %arg3[%c0_5, %c0_6], %5 {strides = array<i32>} : memref<162x128xf32, #tpu.memory_space<vmem>>, vector<162x128xf32>,
    return
  }
}

</mosaic_0001>

<bundles_post_ra>
// kernel: conv2d_forward.1
= control target key start
LH: loop header
LB: loop body
LE: loop exit
PB: predicated region body
PF: predicated region fallthrough
CT: control target
= control target key end

     0   :  { %vm108_vm0 = vcmask 1043456   ;;  %v426_v0 = vmov 0.0   ;;  %vm44_vm1 = vcmask 97280   ;;  %vm427_vm2 = vmmov 0   ;;  %s673_s1 = inlined_call_operand.vmem [shape: f32[12,128], index: 1, kind: input, shape index: {}]   ;;  %s674_s0 = inlined_call_operand.vmem [shape: f32[162,12], index: 0, kind: input, shape index: {}]   ;;  %s675_s2 = inlined_call_operand.vmem [shape: f32[1,128], index: 2, kind: input, shape index: {}]   ;;  %s676_s3 = inlined_call_operand.vmem [shape: f32[162,128], index: 3, kind: output, shape index: {}]  }
   0x1   :  { %353 = vmatprep.subr.mxu0 %v426_v0  ;;  %v36_v1 = vld [vmem:[%s673_s1 + $0x8] sm:$0xf]  ;;  %420 = vmatprep.subr.mxu1 %v426_v0  ;;  %v35_v2 = vld [vmem:[%s673_s1] sm:$0xff]  ;;  %v25_v4 = vld [vmem:[%s674_s0 + $0x58] sm:$0xff] }
   0x2   :  { %354 = vmatpush3.msk.msra.mxu0 %vm108_vm0, %v36_v1  ;;  %422 = vmatpush3.msk.msra.mxu1 %vm108_vm0, %v36_v1  ;;  %v14_v3 = vld [vmem:[%s674_s0] sm:$0xff]  ;;  %v15_v5 = vld [vmem:[%s674_s0 + $0x8] sm:$0xff]  ;;  %v16_v7 = vld [vmem:[%s674_s0 + $0x10] sm:$0xff] }
   0x3   :  { %355 = vmatprep.subr.mxu0 %v426_v0  ;;  %357 = vmatprep.mubr.msk.f32.mxu0 %vm427_vm2, %v426_v0  ;;  %v26_v6 = vld [vmem:[%s674_s0 + $0x60] sm:$0xff]  ;;  %v27_v8 = vld [vmem:[%s674_s0 + $0x68] sm:$0xff]  ;;  %v17_v9 = vld [vmem:[%s674_s0 + $0x18] sm:$0xff] }
   0x4   :  { %356 = vmatpush3.msra.mxu0 %v35_v2  ;;  %421 = vmatprep.subr.mxu1 %v426_v0  ;;  %v28_v10 = vld [vmem:[%s674_s0 + $0x70] sm:$0xff]  ;;  %v18_v11 = vld [vmem:[%s674_s0 + $0x20] sm:$0xff]  ;;  %v29_v12 = vld [vmem:[%s674_s0 + $0x78] sm:$0xff] }
   0x5   :  { %358 = vmatmul.mubr.msk.f32.vlgmr.msra.gmra.mxu0 %vm44_vm1, %v14_v3  ;;  %423 = vmatpush3.msra.mxu1 %v35_v2  ;;  %v19_v13 = vld [vmem:[%s674_s0 + $0x28] sm:$0xff]  ;;  %v30_v14 = vld [vmem:[%s674_s0 + $0x80] sm:$0xff]  ;;  %v20_v15 = vld [vmem:[%s674_s0 + $0x30] sm:$0xff] }
   0x6   :  { %390 = vmatprep.mubr.msk.f32.mxu1 %vm427_vm2, %v426_v0  ;;  %360 = vmatprep.mubr.msk.f32.mxu0 %vm427_vm2, %v426_v0  ;;  %v31_v16 = vld [vmem:[%s674_s0 + $0x88] sm:$0xff]  ;;  %v21_v17 = vld [vmem:[%s674_s0 + $0x38] sm:$0xff]  ;;  %v32_v18 = vld [vmem:[%s674_s0 + $0x90] sm:$0xff] }
   0x7   :  { %391 = vmatmul.mubr.msk.f32.vlgmr.msra.gmra.mxu1 %vm44_vm1, %v25_v4  ;;  %v22_v19 = vld [vmem:[%s674_s0 + $0x40] sm:$0xff]  ;;  %v33_v20 = vld [vmem:[%s674_s0 + $0x98] sm:$0xff]  ;;  %v23_v21 = vld [vmem:[%s674_s0 + $0x48] sm:$0xff] }
   0x8   :  { %393 = vmatprep.mubr.msk.f32.mxu1 %vm427_vm2, %v426_v0  ;;  %v34_v22 = vld [vmem:[%s674_s0 + $0xa0] sm:$0x3]  ;;  %v24_v23 = vld [vmem:[%s674_s0 + $0x50] sm:$0xff] }
   0x9   :  { %361 = vmatmul.mubr.msk.f32.gmra.mxu0 %vm44_vm1, %v15_v5  ;;  %v587_v24 = vld [vmem:[%s675_s2] ss:$0 sm:$0xff] }
   0xa   :  { %363 = vmatprep.mubr.msk.f32.mxu0 %vm427_vm2, %v426_v0 }
   0xb   :  { %394 = vmatmul.mubr.msk.f32.gmra.mxu1 %vm44_vm1, %v26_v6 }
   0xc   :  { %396 = vmatprep.mubr.msk.f32.mxu1 %vm427_vm2, %v426_v0 }
   0xd   :  { %364 = vmatmul.mubr.msk.f32.gmra.mxu0 %vm44_vm1, %v16_v7 }
   0xe   :  { %366 = vmatprep.mubr.msk.f32.mxu0 %vm427_vm2, %v426_v0 }
   0xf   :  { %397 = vmatmul.mubr.msk.f32.gmra.mxu1 %vm44_vm1, %v27_v8 }
  0x10   :  { %399 = vmatprep.mubr.msk.f32.mxu1 %vm427_vm2, %v426_v0 }
  0x11   :  { %367 = vmatmul.mubr.msk.f32.gmra.mxu0 %vm44_vm1, %v17_v9 }
  0x12   :  { %369 = vmatprep.mubr.msk.f32.mxu0 %vm427_vm2, %v426_v0 }
  0x13   :  { %400 = vmatmul.mubr.msk.f32.gmra.mxu1 %vm44_vm1, %v28_v10 }
  0x14   :  { %402 = vmatprep.mubr.msk.f32.mxu1 %vm427_vm2, %v426_v0 }
  0x15   :  { %370 = vmatmul.mubr.msk.f32.gmra.mxu0 %vm44_vm1, %v18_v11 }
  0x16   :  { %372 = vmatprep.mubr.msk.f32.mxu0 %vm427_vm2, %v426_v0 }
  0x17   :  { %403 = vmatmul.mubr.msk.f32.gmra.mxu1 %vm44_vm1, %v29_v12 }
  0x18   :  { %405 = vmatprep.mubr.msk.f32.mxu1 %vm427_vm2, %v426_v0 }
  0x19   :  { %373 = vmatmul.mubr.msk.f32.gmra.mxu0 %vm44_vm1, %v19_v13 }
  0x1a   :  { %375 = vmatprep.mubr.msk.f32.mxu0 %vm427_vm2, %v426_v0 }
  0x1b   :  { %406 = vmatmul.mubr.msk.f32.gmra.mxu1 %vm44_vm1, %v30_v14 }
  0x1c   :  { %408 = vmatprep.mubr.msk.f32.mxu1 %vm427_vm2, %v426_v0 }
  0x1d   :  { %376 = vmatmul.mubr.msk.f32.gmra.mxu0 %vm44_vm1, %v20_v15 }
  0x1e   :  { %378 = vmatprep.mubr.msk.f32.mxu0 %vm427_vm2, %v426_v0 }
  0x1f   :  { %409 = vmatmul.mubr.msk.f32.gmra.mxu1 %vm44_vm1, %v31_v16 }
  0x20   :  { %411 = vmatprep.mubr.msk.f32.mxu1 %vm427_vm2, %v426_v0 }
  0x21   :  { %379 = vmatmul.mubr.msk.f32.gmra.mxu0 %vm44_vm1, %v21_v17 }
  0x22   :  { %381 = vmatprep.mubr.msk.f32.mxu0 %vm427_vm2, %v426_v0 }
  0x23   :  { %412 = vmatmul.mubr.msk.f32.gmra.mxu1 %vm44_vm1, %v32_v18 }
  0x24   :  { %414 = vmatprep.mubr.msk.f32.mxu1 %vm427_vm2, %v426_v0 }
  0x25   :  { %382 = vmatmul.mubr.msk.f32.gmra.mxu0 %vm44_vm1, %v22_v19 }
  0x26   :  { %384 = vmatprep.mubr.msk.f32.mxu0 %vm427_vm2, %v426_v0 }
  0x27   :  { %415 = vmatmul.mubr.msk.f32.gmra.mxu1 %vm44_vm1, %v33_v20 }
  0x28   :  { %417 = vmatprep.mubr.msk.f32.mxu1 %vm427_vm2, %v426_v0 }
  0x29   :  { %385 = vmatmul.mubr.msk.f32.gmra.mxu0 %vm44_vm1, %v23_v21 }
  0x2a   :  { %387 = vmatprep.mubr.msk.f32.mxu0 %vm427_vm2, %v426_v0 }
  0x2b   :  { %418 = vmatmul.mubr.msk.f32.gmra.mxu1 %vm44_vm1, %v34_v22 }
  0x2d   :  { %388 = vmatmul.mubr.msk.f32.gmra.mxu0 %vm44_vm1, %v24_v23 }
  0xc5   :  { %v178_v25 = vpop.f32.mrf.mxu0 }
  0xc6   :  { %v179_v26 = vadd.f32 %v587_v24, %v178_v25 }
  0xc7   :  { %v359_v27 = vpop.f32.mrf.mxu0  ;;  %v233_v28 = vpop.f32.mrf.mxu1 }
  0xc8   :  { %282 = vst [vmem:[%s676_s3] sm:$0xff] %v179_v26  ;;  %v234_v29 = vadd.f32 %v587_v24, %v233_v28 }
  0xc9   :  { %v183_v30 = vpop.f32.mrf.mxu0  ;;  %v392_v31 = vpop.f32.mrf.mxu1 }
  0xca   :  { %293 = vst [vmem:[%s676_s3 + $0x58] sm:$0xff] %v234_v29  ;;  %v184_v32 = vadd.f32 %v587_v24, %v183_v30 }
  0xcb   :  { %v362_v33 = vpop.f32.mrf.mxu0  ;;  %v238_v34 = vpop.f32.mrf.mxu1 }
  0xcc   :  { %283 = vst [vmem:[%s676_s3 + $0x8] sm:$0xff] %v184_v32  ;;  %v239_v35 = vadd.f32 %v587_v24, %v238_v34 }
  0xcd   :  { %v188_v36 = vpop.f32.mrf.mxu0  ;;  %v395_v37 = vpop.f32.mrf.mxu1 }
  0xce   :  { %294 = vst [vmem:[%s676_s3 + $0x60] sm:$0xff] %v239_v35  ;;  %v189_v38 = vadd.f32 %v587_v24, %v188_v36 }
  0xcf   :  { %v365_v39 = vpop.f32.mrf.mxu0  ;;  %v243_v40 = vpop.f32.mrf.mxu1 }
  0xd0   :  { %284 = vst [vmem:[%s676_s3 + $0x10] sm:$0xff] %v189_v38  ;;  %v244_v41 = vadd.f32 %v587_v24, %v243_v40 }
  0xd1   :  { %v193_v42 = vpop.f32.mrf.mxu0  ;;  %v398_v43 = vpop.f32.mrf.mxu1 }
  0xd2   :  { %295 = vst [vmem:[%s676_s3 + $0x68] sm:$0xff] %v244_v41  ;;  %v194_v44 = vadd.f32 %v587_v24, %v193_v42 }
  0xd3   :  { %v368_v45 = vpop.f32.mrf.mxu0  ;;  %v248_v46 = vpop.f32.mrf.mxu1 }
  0xd4   :  { %285 = vst [vmem:[%s676_s3 + $0x18] sm:$0xff] %v194_v44  ;;  %v249_v47 = vadd.f32 %v587_v24, %v248_v46 }
  0xd5   :  { %v198_v48 = vpop.f32.mrf.mxu0  ;;  %v401_v49 = vpop.f32.mrf.mxu1 }
  0xd6   :  { %296 = vst [vmem:[%s676_s3 + $0x70] sm:$0xff] %v249_v47  ;;  %v199_v50 = vadd.f32 %v587_v24, %v198_v48 }
  0xd7   :  { %v371_v51 = vpop.f32.mrf.mxu0  ;;  %v253_v52 = vpop.f32.mrf.mxu1 }
  0xd8   :  { %286 = vst [vmem:[%s676_s3 + $0x20] sm:$0xff] %v199_v50  ;;  %v254_v53 = vadd.f32 %v587_v24, %v253_v52 }
  0xd9   :  { %v203_v54 = vpop.f32.mrf.mxu0  ;;  %v404_v55 = vpop.f32.mrf.mxu1 }
  0xda   :  { %297 = vst [vmem:[%s676_s3 + $0x78] sm:$0xff] %v254_v53  ;;  %v204_v56 = vadd.f32 %v587_v24, %v203_v54 }
  0xdb   :  { %v374_v57 = vpop.f32.mrf.mxu0  ;;  %v258_v58 = vpop.f32.mrf.mxu1 }
  0xdc   :  { %287 = vst [vmem:[%s676_s3 + $0x28] sm:$0xff] %v204_v56  ;;  %v259_v59 = vadd.f32 %v587_v24, %v258_v58 }
  0xdd   :  { %v208_v60 = vpop.f32.mrf.mxu0  ;;  %v407_v61 = vpop.f32.mrf.mxu1 }
  0xde   :  { %298 = vst [vmem:[%s676_s3 + $0x80] sm:$0xff] %v259_v59  ;;  %v209_v62 = vadd.f32 %v587_v24, %v208_v60 }
  0xdf   :  { %v377_v63 = vpop.f32.mrf.mxu0  ;;  %v263_v0 = vpop.f32.mrf.mxu1 }
  0xe0   :  { %288 = vst [vmem:[%s676_s3 + $0x30] sm:$0xff] %v209_v62  ;;  %v264_v1 = vadd.f32 %v587_v24, %v263_v0 }
  0xe1   :  { %v213_v2 = vpop.f32.mrf.mxu0  ;;  %v410_v3 = vpop.f32.mrf.mxu1 }
  0xe2   :  { %299 = vst [vmem:[%s676_s3 + $0x88] sm:$0xff] %v264_v1  ;;  %v214_v4 = vadd.f32 %v587_v24, %v213_v2 }
  0xe3   :  { %v380_v5 = vpop.f32.mrf.mxu0  ;;  %v268_v6 = vpop.f32.mrf.mxu1 }
  0xe4   :  { %289 = vst [vmem:[%s676_s3 + $0x38] sm:$0xff] %v214_v4  ;;  %v269_v7 = vadd.f32 %v587_v24, %v268_v6 }
  0xe5   :  { %v218_v8 = vpop.f32.mrf.mxu0  ;;  %v413_v9 = vpop.f32.mrf.mxu1 }
  0xe6   :  { %300 = vst [vmem:[%s676_s3 + $0x90] sm:$0xff] %v269_v7  ;;  %v219_v10 = vadd.f32 %v587_v24, %v218_v8 }
  0xe7   :  { %v383_v11 = vpop.f32.mrf.mxu0  ;;  %v273_v12 = vpop.f32.mrf.mxu1 }
  0xe8   :  { %290 = vst [vmem:[%s676_s3 + $0x40] sm:$0xff] %v219_v10  ;;  %v274_v13 = vadd.f32 %v587_v24, %v273_v12 }
  0xe9   :  { %v223_v14 = vpop.f32.mrf.mxu0  ;;  %v416_v15 = vpop.f32.mrf.mxu1 }
  0xea   :  { %301 = vst [vmem:[%s676_s3 + $0x98] sm:$0xff] %v274_v13  ;;  %v224_v16 = vadd.f32 %v587_v24, %v223_v14 }
  0xeb   :  { %v386_v17 = vpop.f32.mrf.mxu0  ;;  %v278_v18 = vpop.f32.mrf.mxu1 }
  0xec   :  { %291 = vst [vmem:[%s676_s3 + $0x48] sm:$0xff] %v224_v16  ;;  %v279_v19 = vadd.f32 %v587_v24, %v278_v18 }
  0xed   :  { %v228_v20 = vpop.f32.mrf.mxu0  ;;  %v419_v21 = vpop.f32.mrf.mxu1 }
  0xee   :  { %302 = vst [vmem:[%s676_s3 + $0xa0] sm:$0x3] %v279_v19  ;;  %v229_v22 = vadd.f32 %v587_v24, %v228_v20 }
  0xef   :  { %v389_v23 = vpop.f32.mrf.mxu0 }
  0xf0   :  { %292 = vst [vmem:[%s676_s3 + $0x50] sm:$0xff] %v229_v22 }

</bundles_post_ra>
